<compile_context>
chip_gen: v7x
topology: tpu7x:2x2x1
jax: 0.10.0
libtpu: 0.0.40
codegen_flags: <defaults>
</compile_context>

<pallas_src>
import math
from functools import partial

import jax
import jax.numpy as jnp
from jax import lax
from jax.experimental import pallas as pl
from jax.experimental.pallas import tpu as pltpu

# Module hyper-parameters (DistributionalRewardHead defaults, num_objectives=2)
HIDDEN = 32
HIDDEN2 = HIDDEN // 2
NUM_OBJECTIVES = 2
NUM_ATOMS = 51
ATOMS_BLOCK = 128                   # both objectives packed into ONE 128-lane block
OBJ_STRIDE = 64                     # objective o occupies lanes [o*64, o*64 + NUM_ATOMS)
V_MIN, V_MAX = -10.0, 10.0
NEG_BIG = -1e30                     # finite "minus infinity" for padded logit lanes

BATCH, SEQ = 4, 8                   # hidden_states: (BATCH, SEQ, HIDDEN)

assert NUM_OBJECTIVES * OBJ_STRIDE == ATOMS_BLOCK and NUM_ATOMS <= OBJ_STRIDE


def _round_up(x, m):
    return (x + m - 1) // m * m


def reward_head_kernel(x_ref, w1_ref, b1_ref, w2_ref, b2_ref, red_ref, out_ref):
    """One row tile: Linear -> ReLU -> Linear -> packed per-objective softmax expectation."""
    # bf16 MXU matmuls with f32 accumulation; elementwise softmax math stays f32.
    x = x_ref[...].astype(w1_ref.dtype)                                   # (TN, H)
    h = jnp.dot(x, w1_ref[...], preferred_element_type=jnp.float32) + b1_ref[...]
    h = jnp.maximum(h, 0.0)                                               # ReLU (f32)
    # TODO(synk): train-mode nn.Dropout not implemented; inference forward treats it as identity.
    logits = jnp.dot(h.astype(w2_ref.dtype), w2_ref[...],
                     preferred_element_type=jnp.float32) + b2_ref[...]    # (TN, 128)

    # Per-objective max (XLU) on the packed 128-lane block: mask the other half.
    lane = lax.broadcasted_iota(jnp.int32, (1, ATOMS_BLOCK), 1)
    is_obj0 = lane < OBJ_STRIDE                                           # (1, 128)
    m0 = jnp.max(jnp.where(is_obj0, logits, NEG_BIG), axis=-1, keepdims=True)
    m1 = jnp.max(jnp.where(is_obj0, NEG_BIG, logits), axis=-1, keepdims=True)
    m = jnp.where(is_obj0, m0, m1)                                        # (TN, 128)
    e = jnp.exp(logits - m)          # padded lanes: exp(-1e30 - m) underflows to exactly 0

    # Softmax sums ride the otherwise-idle MXU: e @ R -> [num0, num1, den0, den1].
    nd = jnp.dot(e, red_ref[...], preferred_element_type=jnp.float32)     # (TN, 4) f32
    num = nd[:, :NUM_OBJECTIVES]
    den = nd[:, NUM_OBJECTIVES:]
    # approx reciprocal runs on the EUP slot (~free); <=1e-2 abs error on |reward|<=10.
    out_ref[...] = (num * pl.reciprocal(den, approx=True)).astype(out_ref.dtype)


@partial(jax.jit, static_argnames=("row_tile", "vmem_limit_mib"))
def distributional_reward_head(hidden_states, w1, b1, w2p, b2p, red,
                               *, row_tile=4096, vmem_limit_mib=32):
    # Flatten leading dims exactly like logits.view(-1, O, A) implies; no dtype pass over HBM.
    x = hidden_states.reshape(-1, hidden_states.shape[-1])
    n = x.shape[0]
    # Row tile: multiple of 16 (bf16 sublane packing). Default 4096 is v7x-safe with a
    # 32 MiB scoped VMEM limit; on v5e/v6e use row_tile=8192 with vmem_limit_mib=64.
    tile_n = min(_round_up(row_tile, 16), _round_up(n, 16))
    # v7x megacore: for moderate/large N keep at least 2 row tiles so the "parallel"
    # grid axis can shard work across both TensorCores (no-op on v5e/v6e, 1 TC).
    if n >= 512 and _round_up(n, tile_n) == tile_n:
        tile_n = _round_up((n + 1) // 2, 16)
    n_pad = _round_up(n, tile_n)
    if n_pad != n:
        x = jnp.pad(x, ((0, n_pad - n), (0, 0)))
    grid = (n_pad // tile_n,)

    def resident(shape):
        # Whole-array block with a constant index map: stays in VMEM and never changes,
        # so a single buffer suffices (no double-buffering bookkeeping).
        return pl.BlockSpec(shape, lambda i: (0, 0), pipeline_mode=pl.Buffered(1))

    out = pl.pallas_call(
        reward_head_kernel,
        out_shape=jax.ShapeDtypeStruct((n_pad, NUM_OBJECTIVES), jnp.float32),
        grid=grid,
        in_specs=[
            pl.BlockSpec((tile_n, HIDDEN), lambda i: (i, 0)),      # x: row-tiled, pipelined
            resident((HIDDEN, HIDDEN2)),                           # W1 (bf16)
            resident((1, HIDDEN2)),                                # b1 (f32)
            resident((HIDDEN2, ATOMS_BLOCK)),                      # W2 packed/padded (bf16)
            resident((1, ATOMS_BLOCK)),                            # b2 (pad lanes = -1e30)
            resident((ATOMS_BLOCK, 2 * NUM_OBJECTIVES)),           # R: [support | ones] columns
        ],
        out_specs=pl.BlockSpec((tile_n, NUM_OBJECTIVES), lambda i: (i, 0)),
        compiler_params=pltpu.CompilerParams(
            dimension_semantics=("parallel",),                     # shard row tiles across TCs
            vmem_limit_bytes=vmem_limit_mib * 1024 * 1024,
        ),
    )(x, w1, b1, w2p, b2p, red)
    return out[:n]


def init_params(key, hidden_size=HIDDEN, num_objectives=NUM_OBJECTIVES, num_atoms=NUM_ATOMS):
    """PyTorch-Linear-style init (uniform +/- 1/sqrt(fan_in)); weights stored (in, out)."""
    h2 = hidden_size // 2
    k1, k2, k3, k4 = jax.random.split(key, 4)
    lim1 = 1.0 / math.sqrt(hidden_size)
    lim2 = 1.0 / math.sqrt(h2)
    w1 = jax.random.uniform(k1, (hidden_size, h2), jnp.float32, -lim1, lim1)
    b1 = jax.random.uniform(k2, (1, h2), jnp.float32, -lim1, lim1)
    w2 = jax.random.uniform(k3, (h2, num_objectives * num_atoms), jnp.float32, -lim2, lim2)
    b2 = jax.random.uniform(k4, (1, num_objectives * num_atoms), jnp.float32, -lim2, lim2)
    support = jnp.linspace(V_MIN, V_MAX, num_atoms, dtype=jnp.float32)
    return w1, b1, w2, b2, support


def prepare_kernel_params(w1, b1, w2, b2, support):
    """Kernel layout: bf16 weights; both objectives packed into one 128-lane atom block,
    plus the (128, 4) block-diagonal [support | ones] reduction matrix for the MXU sums."""
    h2 = w1.shape[1]
    w2p = jnp.zeros((h2, ATOMS_BLOCK), jnp.float32)
    b2p = jnp.full((1, ATOMS_BLOCK), NEG_BIG, jnp.float32)
    red = jnp.zeros((ATOMS_BLOCK, 2 * NUM_OBJECTIVES), jnp.float32)
    for o in range(NUM_OBJECTIVES):
        src = slice(o * NUM_ATOMS, (o + 1) * NUM_ATOMS)
        dst = slice(o * OBJ_STRIDE, o * OBJ_STRIDE + NUM_ATOMS)
        w2p = w2p.at[:, dst].set(w2[:, src])
        b2p = b2p.at[:, dst].set(b2[:, src])
        red = red.at[dst, o].set(support)                      # numerator column (support)
        red = red.at[dst, NUM_OBJECTIVES + o].set(1.0)         # denominator column (ones)
    return (w1.astype(jnp.bfloat16), b1.astype(jnp.float32),
            w2p.astype(jnp.bfloat16), b2p, red)


def reference_forward(hidden_states, w1, b1, w2, b2, support):
    """Pure-JAX reference of the PyTorch module (same bf16-matmul / f32-softmax policy)."""
    x = hidden_states.reshape(-1, hidden_states.shape[-1]).astype(jnp.bfloat16)
    h = jnp.dot(x, w1.astype(jnp.bfloat16), preferred_element_type=jnp.float32) + b1
    h = jnp.maximum(h, 0.0)
    logits = jnp.dot(h.astype(jnp.bfloat16), w2.astype(jnp.bfloat16),
                     preferred_element_type=jnp.float32) + b2
    logits = logits.reshape(-1, NUM_OBJECTIVES, NUM_ATOMS)
    p = jax.nn.softmax(logits, axis=-1)
    return jnp.sum(p * support.reshape(1, 1, NUM_ATOMS), axis=-1)


if __name__ == "__main__":
    key = jax.random.PRNGKey(0)
    k_x, k_x2, k_p = jax.random.split(key, 3)
    # Upstream produces bf16 activations -> no extra f32->bf16 HBM pass before the kernel.
    hidden_states = jax.random.normal(k_x, (BATCH, SEQ, HIDDEN), jnp.float32).astype(jnp.bfloat16)
    w1, b1, w2, b2, support = init_params(k_p)
    kparams = prepare_kernel_params(w1, b1, w2, b2, support)

    # Small demo: row_tile=16 forces a multi-step grid at these tiny shapes.
    # Production sizing: row_tile=4096 (v7x, 32 MiB limit) / 8192 (v5e/v6e, 64 MiB limit).
    out = jax.block_until_ready(distributional_reward_head(hidden_states, *kparams, row_tile=16))
    ref = reference_forward(hidden_states, w1, b1, w2, b2, support)
    assert out.shape == (BATCH * SEQ, NUM_OBJECTIVES), out.shape
    # Tolerance: approx (EUP) reciprocal has ~1e-3 relative error; |expected reward| <= 10.
    assert jnp.allclose(out, ref, atol=5e-2, rtol=0.0), float(jnp.max(jnp.abs(out - ref)))

    # Row count not a multiple of the tile -> exercises the pad-and-slice path + default tile.
    hs2 = jax.random.normal(k_x2, (2, 5, HIDDEN), jnp.float32).astype(jnp.bfloat16)
    out2 = jax.block_until_ready(distributional_reward_head(hs2, *kparams))
    ref2 = reference_forward(hs2, w1, b1, w2, b2, support)
    assert out2.shape == (10, NUM_OBJECTIVES), out2.shape
    assert jnp.allclose(out2, ref2, atol=5e-2, rtol=0.0), float(jnp.max(jnp.abs(out2 - ref2)))

    print("KERNEL_OK")
</pallas_src>

<mosaic_0001>
module attributes {stable_mosaic.version = 11 : i64} {
  func.func @reward_head_kernel(%arg0: i32, %arg1: memref<16x32xbf16, #tpu.memory_space<vmem>>, %arg2: memref<32x16xbf16, #tpu.memory_space<vmem>>, %arg3: memref<1x16xf32, #tpu.memory_space<vmem>>, %arg4: memref<16x128xbf16, #tpu.memory_space<vmem>>, %arg5: memref<1x128xf32, #tpu.memory_space<vmem>>, %arg6: memref<128x4xf32, #tpu.memory_space<vmem>>, %arg7: memref<16x2xf32, #tpu.memory_space<vmem>>) attributes {dimension_semantics = [#tpu.dimension_semantics<parallel>], iteration_bounds = array<i64: 2>, scalar_prefetch = 0 : i64, scratch_operands = 0 : i64, tpu.core_type = #tpu.core_type<tc>, window_params = [{transform_indices = @transform_0, window_bounds = array<i64: 16, 32>}, {pipeline_mode = #tpu.pipeline_mode<synchronous>, transform_indices = @transform_1, window_bounds = array<i64: 32, 16>}, {pipeline_mode = #tpu.pipeline_mode<synchronous>, transform_indices = @transform_2, window_bounds = array<i64: 1, 16>}, {pipeline_mode = #tpu.pipeline_mode<synchronous>, transform_indices = @transform_3, window_bounds = array<i64: 16, 128>}, {pipeline_mode = #tpu.pipeline_mode<synchronous>, transform_indices = @transform_4, window_bounds = array<i64: 1, 128>}, {pipeline_mode = #tpu.pipeline_mode<synchronous>, transform_indices = @transform_5, window_bounds = array<i64: 128, 4>}, {transform_indices = @transform_6, window_bounds = array<i64: 16, 2>}]} {
    %c0 = arith.constant 0 : index
    %c0_0 = arith.constant 0 : index
    %0 = vector.load %arg1[%c0, %c0_0] : memref<16x32xbf16, #tpu.memory_space<vmem>>, vector<16x32xbf16>
    %c0_1 = arith.constant 0 : index
    %c0_2 = arith.constant 0 : index
    %1 = vector.load %arg2[%c0_1, %c0_2] : memref<32x16xbf16, #tpu.memory_space<vmem>>, vector<32x16xbf16>
    %cst = arith.constant dense<0.000000e+00> : vector<16x16xf32>
    %2 = tpu.matmul %0, %1, %cst {dimension_numbers = #tpu.dot_dimension_numbers<[1], [0], [0], [1], [0, 0, 1, 1], [], []>} : vector<16x32xbf16>, vector<32x16xbf16>, vector<16x16xf32> -> vector<16x16xf32>
    %c0_3 = arith.constant 0 : index
    %c0_4 = arith.constant 0 : index
    %3 = vector.load %arg3[%c0_3, %c0_4] : memref<1x16xf32, #tpu.memory_space<vmem>>, vector<1x16xf32>
    %4 = vector.broadcast %3 : vector<1x16xf32> to vector<16x16xf32>
    %5 = arith.addf %2, %4 : vector<16x16xf32>
    %cst_5 = arith.constant 0.000000e+00 : f32
    %6 = vector.broadcast %cst_5 : f32 to vector<16x16xf32>
    %7 = arith.maximumf %5, %6 : vector<16x16xf32>
    %8 = arith.truncf %7 : vector<16x16xf32> to vector<16x16xbf16>
    %c0_6 = arith.constant 0 : index
    %c0_7 = arith.constant 0 : index
    %9 = vector.load %arg4[%c0_6, %c0_7] : memref<16x128xbf16, #tpu.memory_space<vmem>>, vector<16x128xbf16>
    %cst_8 = arith.constant dense<0.000000e+00> : vector<16x128xf32>
    %10 = tpu.matmul %8, %9, %cst_8 {dimension_numbers = #tpu.dot_dimension_numbers<[1], [0], [0], [1], [0, 0, 1, 1], [], []>} : vector<16x16xbf16>, vector<16x128xbf16>, vector<16x128xf32> -> vector<16x128xf32>
    %c0_9 = arith.constant 0 : index
    %c0_10 = arith.constant 0 : index
    %11 = vector.load %arg5[%c0_9, %c0_10] : memref<1x128xf32, #tpu.memory_space<vmem>>, vector<1x128xf32>
    %12 = vector.broadcast %11 : vector<1x128xf32> to vector<16x128xf32>
    %13 = arith.addf %10, %12 : vector<16x128xf32>
    %14 = tpu.iota {dimensions = array<i32: 1>} : vector<1x128xi32>
    %c64_i32 = arith.constant 64 : i32
    %15 = vector.broadcast %c64_i32 : i32 to vector<1x128xi32>
    %16 = arith.cmpi slt, %14, %15 : vector<1x128xi32>
    %cst_11 = arith.constant -1.000000e+30 : f32
    %17 = vector.shape_cast %16 : vector<1x128xi1> to vector<1x128xi1>
    %18 = vector.broadcast %17 : vector<1x128xi1> to vector<16x128xi1>
    %19 = vector.broadcast %cst_11 : f32 to vector<16x128xf32>
    %20 = arith.select %18, %13, %19 : vector<16x128xi1>, vector<16x128xf32>
    %cst_12 = arith.constant dense<0xFF800000> : vector<16xf32>
    %21 = vector.multi_reduction <maximumf>, %20, %cst_12 [1] : vector<16x128xf32> to vector<16xf32>
    %22 = vector.shape_cast %21 : vector<16xf32> to vector<16x1xf32>
    %cst_13 = arith.constant -1.000000e+30 : f32
    %23 = vector.shape_cast %16 : vector<1x128xi1> to vector<1x128xi1>
    %24 = vector.broadcast %23 : vector<1x128xi1> to vector<16x128xi1>
    %25 = vector.broadcast %cst_13 : f32 to vector<16x128xf32>
    %26 = arith.select %24, %25, %13 : vector<16x128xi1>, vector<16x128xf32>
    %cst_14 = arith.constant dense<0xFF800000> : vector<16xf32>
    %27 = vector.multi_reduction <maximumf>, %26, %cst_14 [1] : vector<16x128xf32> to vector<16xf32>
    %28 = vector.shape_cast %27 : vector<16xf32> to vector<16x1xf32>
    %29 = vector.shape_cast %16 : vector<1x128xi1> to vector<1x128xi1>
    %30 = vector.broadcast %29 : vector<1x128xi1> to vector<16x128xi1>
    %31 = vector.shape_cast %22 : vector<16x1xf32> to vector<16x1xf32>
    %32 = vector.broadcast %31 : vector<16x1xf32> to vector<16x128xf32>
    %33 = vector.shape_cast %28 : vector<16x1xf32> to vector<16x1xf32>
    %34 = vector.broadcast %33 : vector<16x1xf32> to vector<16x128xf32>
    %35 = arith.select %30, %32, %34 : vector<16x128xi1>, vector<16x128xf32>
    %36 = arith.subf %13, %35 : vector<16x128xf32>
    %37 = math.exp %36 : vector<16x128xf32>
    %c0_15 = arith.constant 0 : index
    %c0_16 = arith.constant 0 : index
    %38 = vector.load %arg6[%c0_15, %c0_16] : memref<128x4xf32, #tpu.memory_space<vmem>>, vector<128x4xf32>
    %cst_17 = arith.constant dense<0.000000e+00> : vector<16x4xf32>
    %39 = tpu.matmul %37, %38, %cst_17 {dimension_numbers = #tpu.dot_dimension_numbers<[1], [0], [0], [1], [0, 0, 1, 1], [], []>} : vector<16x128xf32>, vector<128x4xf32>, vector<16x4xf32> -> vector<16x4xf32>
    %40 = vector.extract_strided_slice %39 {offsets = [0, 0], sizes = [16, 2], strides = [1, 1]} : vector<16x4xf32> to vector<16x2xf32>
    %41 = vector.extract_strided_slice %39 {offsets = [0, 2], sizes = [16, 2], strides = [1, 1]} : vector<16x4xf32> to vector<16x2xf32>
    %42 = tpu.reciprocal %41 {approx = true} : vector<16x2xf32> -> vector<16x2xf32>
    %43 = arith.mulf %40, %42 : vector<16x2xf32>
    %c0_18 = arith.constant 0 : index
    %c0_19 = arith.constant 0 : index
    %44 = vector.load %arg7[%c0_18, %c0_19] : memref<16x2xf32, #tpu.memory_space<vmem>>, vector<16x2xf32>
    tpu.vector_store %arg7[%c0_18, %c0_19], %43 {strides = array<i32>} : memref<16x2xf32, #tpu.memory_space<vmem>>, vector<16x2xf32>,
    return
  }
  func.func @transform_0(%arg0: i32) -> (i32, i32) {
    %c0_i32 = arith.constant 0 : i32
    %c0_i32_0 = arith.constant 0 : i32
    return %arg0, %c0_i32 : i32, i32
  }
  func.func @transform_1(%arg0: i32) -> (i32, i32) {
    %c0_i32 = arith.constant 0 : i32
    %c0_i32_0 = arith.constant 0 : i32
    %c0_i32_1 = arith.constant 0 : i32
    return %c0_i32, %c0_i32_0 : i32, i32
  }
  func.func @transform_2(%arg0: i32) -> (i32, i32) {
    %c0_i32 = arith.constant 0 : i32
    %c0_i32_0 = arith.constant 0 : i32
    %c0_i32_1 = arith.constant 0 : i32
    return %c0_i32, %c0_i32_0 : i32, i32
  }
  func.func @transform_3(%arg0: i32) -> (i32, i32) {
    %c0_i32 = arith.constant 0 : i32
    %c0_i32_0 = arith.constant 0 : i32
    %c0_i32_1 = arith.constant 0 : i32
    return %c0_i32, %c0_i32_0 : i32, i32
  }
  func.func @transform_4(%arg0: i32) -> (i32, i32) {
    %c0_i32 = arith.constant 0 : i32
    %c0_i32_0 = arith.constant 0 : i32
    %c0_i32_1 = arith.constant 0 : i32
    return %c0_i32, %c0_i32_0 : i32, i32
  }
  func.func @transform_5(%arg0: i32) -> (i32, i32) {
    %c0_i32 = arith.constant 0 : i32
    %c0_i32_0 = arith.constant 0 : i32
    %c0_i32_1 = arith.constant 0 : i32
    return %c0_i32, %c0_i32_0 : i32, i32
  }
  func.func @transform_6(%arg0: i32) -> (i32, i32) {
    %c0_i32 = arith.constant 0 : i32
    %c0_i32_0 = arith.constant 0 : i32
    return %arg0, %c0_i32 : i32, i32
  }
}

</mosaic_0001>

<bundles_post_ra>
// kernel: distributional_reward_head.1
= control target key start
LH: loop header
LB: loop body
LE: loop exit
PB: predicated region body
PF: predicated region fallthrough
CT: control target
= control target key end

     0   :  { %s773_s21 = smov 0   ;;  %s863_s0 = inlined_call_operand.vmem [shape: bf16[32,32], index: 0, kind: input, shape index: {}]   ;;  %s864_s1 = inlined_call_operand.vmem [shape: bf16[32,16], index: 1, kind: input, shape index: {}]   ;;  %s865_s2 = inlined_call_operand.vmem [shape: f32[1,16], index: 2, kind: input, shape index: {}]   ;;  %s866_s3 = inlined_call_operand.vmem [shape: bf16[16,128], index: 3, kind: input, shape index: {}]   ;;  %s867_s4 = inlined_call_operand.vmem [shape: f32[1,128], index: 4, kind: input, shape index: {}]   ;;  %s868_s5 = inlined_call_operand.vmem [shape: f32[128,4], index: 5, kind: input, shape index: {}]   ;;  %s869_s6 = inlined_call_operand.vmem [shape: f32[32,2], index: 6, kind: output, shape index: {}]  }
   0x1 LB: > { %s581_s22 = sadd.s32 4294967295, %s733_s21   ;;  %p585_p0 = scmp.ge.s32.totalorder %s733_s21, 1  ;;  %s733_s21 = sphi %s773_s21, %s16_s21  }
   0x2   : > { %p213_p1 = scmp.lt.s32.totalorder %s733_s21, 3 }
   0x4   : > { %p214_p2 = pnand %p585_p0, %p213_p1 }
   0x5   : > { %v715_v0 = vld [vmem:[%s864_s1] sm:$0xff] (!%p214_p2)   ;;  %v735_v1 = vmov (!%p214_p2), 0.0   ;;  %v716_v2 = vld [vmem:[%s864_s1 + $0x8] sm:$0xff] (!%p214_p2)   ;;  %vm736_vm0 = vmmov (!%p214_p2), 0   ;;  %s586_s27 = sshll.u32 (!%p214_p2), %s581_s22, 1  ;;  %vm286_vm1 = vcmask (!%p214_p2), 261120   ;;  %v394_v24 = vlaneseq (!%p214_p2) }
   0x6   : > { %217 = sbr.rel (%p214_p2) target bundleno = 958 (0x3be), region = 44  ;;  %623 = vmatprep.subr.bf16.mxu0 (!%p214_p2), %v735_v1  ;;  %627 = vmatprep.mubr.msk.bf16.mxu0 (!%p214_p2), %vm736_vm0, %v735_v1  ;;  %p244_p3 = scmp.lt.s32.totalorder (!%p214_p2), %s586_s27, 3  ;;  %v718_v4 = vld [vmem:[%s866_s3] sm:$0xff] (!%p214_p2)   ;;  %vm349_vm2 = vcmask (!%p214_p2), 130048   ;;  %v420_v16 = vld [vmem:[%s868_s5 + $0x8] sm:$0xff] (!%p214_p2)  ;;  %v421_v17 = vld [vmem:[%s868_s5 + $0x10] sm:$0xff] (!%p214_p2) }
   0x7   : > { %624 = vmatpush3.bf16.msra.mxu0 (!%p214_p2), %v715_v0  ;;  %v590_v5 = vld [vmem:[%s865_s2] ss:$0 sm:$0xff] (!%p214_p2)  ;;  %v422_v19 = vld [vmem:[%s868_s5 + $0x18] sm:$0xff] (!%p214_p2)  ;;  %v424_v22 = vld [vmem:[%s868_s5 + $0x28] sm:$0xff] (!%p214_p2)  ;;  %v395_v25 = vand.u32 (!%p214_p2), 127, %v394_v24  ;;  %s737_s25 = smov (!%p214_p2), 126  }
   0x8   : > { %625 = vmatprep.subr.bf16.mxu0 (!%p214_p2), %v735_v1  ;;  %v419_v15 = vld [vmem:[%s868_s5] sm:$0xff] (!%p214_p2)  ;;  %v676_v20 = vpack.c.bf16 (!%p214_p2), %v422_v19, %v421_v17  ;;  %v425_v37 = vld [vmem:[%s868_s5 + $0x30] sm:$0xff] (!%p214_p2)  ;;  %v426_v38 = vld [vmem:[%s868_s5 + $0x38] sm:$0xff] (!%p214_p2)  ;;  %vm522_vm4 = vcmask (!%p214_p2), 15360  }
   0x9   : > { %v672_v18 = vpack.c.bf16 (!%p214_p2), %v420_v16, %v419_v15  ;;  %v423_v21 = vld [vmem:[%s868_s5 + $0x20] sm:$0xff] (!%p214_p2)  ;;  %vm396_vm3 = vcmp.lt.s32.totalorder (!%p214_p2), %v395_v25, 64  ;;  %v684_v39 = vpack.c.bf16 (!%p214_p2), %v426_v38, %v425_v37  ;;  %v428_v41 = vld [vmem:[%s868_s5 + $0x48] sm:$0xff] (!%p214_p2)  ;;  %v429_v43 = vld [vmem:[%s868_s5 + $0x50] sm:$0xff] (!%p214_p2) }
   0xa   : > { %v680_v23 = vpack.c.bf16 (!%p214_p2), %v424_v22, %v423_v21  ;;  %v595_v26 = vld [vmem:[%s867_s4] ss:$0 sm:$0xff] (!%p214_p2)  ;;  %v430_v44 = vld [vmem:[%s868_s5 + $0x58] sm:$0xff] (!%p214_p2)  ;;  %v432_v47 = vld [vmem:[%s868_s5 + $0x68] sm:$0xff] (!%p214_p2) }
   0xb   : > { %626 = vmatpush3.bf16.msra.mxu0 (!%p214_p2), %v716_v2  ;;  %673 = vmatprep.subr.bf16.mxu1 (!%p214_p2), %v672_v18  ;;  %v427_v40 = vld [vmem:[%s868_s5 + $0x40] sm:$0xff] (!%p214_p2)  ;;  %v692_v45 = vpack.c.bf16 (!%p214_p2), %v430_v44, %v429_v43  ;;  %v433_v48 = vld [vmem:[%s868_s5 + $0x70] sm:$0xff] (!%p214_p2)  ;;  %v434_v50 = vld [vmem:[%s868_s5 + $0x78] sm:$0xff] (!%p214_p2) }
   0xc   : > { %631 = vmatprep.subr.bf16.mxu0 (!%p214_p2), %v735_v1  ;;  %675 = vmatpush3.bf16.msra.mxu1 (!%p214_p2), %v672_v18  ;;  %v688_v42 = vpack.c.bf16 (!%p214_p2), %v428_v41, %v427_v40  ;;  %v431_v46 = vld [vmem:[%s868_s5 + $0x60] sm:$0xff] (!%p214_p2)  ;;  %v700_v51 = vpack.c.bf16 (!%p214_p2), %v434_v50, %v433_v48 }
   0xd   : > { %s871_s27 = smov (!%p244_p3, %s586_s27), 3  ;;  %677 = vmatprep.subr.bf16.mxu1 %v676_v20  ;;  %v696_v49 = vpack.c.bf16 %v432_v47, %v431_v46 }
   0xe   : > { %s587_s28 = sshll.u32 %s871_s27, 2  ;;  %s589_s26 = sshll.u32 %s871_s27, 3 }
   0xf   : > { %s247_s7 = scalar_lea.vmem %s863_s0, %s587_s28  ;;  %s253_s30 = scalar_lea.vmem %s869_s6, %s589_s26 }
  0x10   : > { %v717_v3 = vld [vmem:[%s247_s7] sm:$0xff]   ;;  %679 = vmatpush3.bf16.msra.mxu1 %v676_v20 }
  0x11   : > { %628 = vmatmul.mubr.msk.bf16.vlgmr.msra.gmra.mrb[0].mxu0 %vm286_vm1, %v717_v3  ;;  %681 = vmatprep.subr.bf16.mxu1 %v680_v23 }
  0x12   : > { %633 = vmatprep.mubr.msk.bf16.mxu0 %vm736_vm0, %v735_v1  ;;  %632 = vmatpush3.bf16.msra.mxu0 %v718_v4 }
  0x14   : > { %683 = vmatpush3.bf16.msra.mxu1 %v680_v23 }
  0x15   : > { %685 = vmatprep.subr.bf16.mxu1 %v684_v39 }
  0x18   : > { %687 = vmatpush3.bf16.msra.mxu1 %v684_v39 }
  0x19   : > { %689 = vmatprep.subr.bf16.mxu1 %v688_v42 }
  0x1c   : > { %691 = vmatpush3.bf16.msra.mxu1 %v688_v42 }
  0x1d   : > { %693 = vmatprep.subr.bf16.mxu1 %v692_v45 }
  0x20   : > { %695 = vmatpush3.bf16.msra.mxu1 %v692_v45 }
  0x21   : > { %697 = vmatprep.subr.bf16.mxu1 %v696_v49 }
  0x24   : > { %699 = vmatpush3.bf16.msra.mxu1 %v696_v49 }
  0x25   : > { %701 = vmatprep.subr.bf16.mxu1 %v700_v51 }
  0x28   : > { %703 = vmatpush3.bf16.msra.mxu1 %v700_v51 }
  0xe4   : > { %v324_v6 = vpop.f32.mrb[0].mxu0 }
  0xe5   : > { %v325_v7 = vadd.f32 %v590_v5, %v324_v6  ;;  %v629_v8 = vpop.f32.mrb[1].mxu0 }
  0xe6   : > { %v327_v9 = vpop.f32.mrb[2].mxu0 }
  0xe7   : > { %v328_v10 = vadd.f32 %v590_v5, %v327_v9  ;;  %v630_v11 = vpop.f32.mrb[3].mxu0  ;;  %v331_v12 = vmax.f32 %v325_v7, 0.0 }
  0xe9   : > { %v332_v13 = vmax.f32 %v328_v10, 0.0 }
  0xeb   : > { %v333_v14 = vpack.c.bf16 %v332_v13, %v331_v12 }
  0xed   : > { %634 = vmatmul.mubr.msk.bf16.vlgmr.msra.gmra.mrb[4].mxu0 %vm349_vm2, %v333_v14 }
 0x1c0   : > { %v387_v27 = vpop.f32.mrb[4].mxu0 }
 0x1c1   : > { %v388_v28 = vadd.f32 %v595_v26, %v387_v27  ;;  %v635_v29 = vpop.f32.mrb[5].mxu0 }
 0x1c2   : > { %v390_v30 = vpop.f32.mrb[6].mxu0 }
 0x1c3   : > { %v391_v31 = vadd.f32 %v595_v26, %v390_v30  ;;  %v636_v32 = vpop.f32.mrb[7].mxu0  ;;  %v399_v33 = vsel %vm396_vm3, %v388_v28, -1e+30  ;;  %v405_v35 = vsel %vm396_vm3, -1e+30, %v388_v28 }
 0x1c4   : > { %401 = vmax.xlane.f32.xlu0 %v399_v33 }
 0x1c5   : > { %v400_v34 = vsel %vm396_vm3, %v391_v31, -1e+30  ;;  %v406_v36 = vsel %vm396_vm3, -1e+30, %v391_v31 }
 0x1c6   : > { %403 = vmax.xlane.f32.xlu1 %v400_v34 }
 0x1c8   : > { %407 = vmax.xlane.f32.xlu0 %v405_v35 }
 0x1ca   : > { %409 = vmax.xlane.f32.xlu1 %v406_v36 }
 0x251   : > { %v402_v52 = vpop.xlane.xlu0 %401 }
 0x253   : > { %v404_v53 = vpop.xlane.xlu1 %403 }
 0x255   : > { %v408_v54 = vpop.xlane.xlu0 %407 }
 0x256   : > { %v411_v55 = vsel %vm396_vm3, %v402_v52, %v408_v54 }
 0x257   : > { %v413_v56 = vsub.f32 %v388_v28, %v411_v55  ;;  %v410_v57 = vpop.xlane.xlu1 %409 }
 0x258   : > { %v412_v58 = vsel %vm396_vm3, %v404_v53, %v410_v57 }
 0x259   : > { %v414_v59 = vsub.f32 %v391_v31, %v412_v58  ;;  %v415_v60 = vmul.f32 1.442695, %v413_v56 }
 0x25b   : > { %v417_v61 = vmul.f32 1.442695, %v414_v59  ;;  %719 = vpow2.f32 %v415_v60 }
 0x25d   : > { %721 = vpow2.f32 %v417_v61 }
 0x265   : > { %v720_v62 = vpop.eup %719 }
 0x266   : > { %669 = vmatprep.mubr.f32.mxu1 %v720_v62 }
 0x267   : > { %v722_v63 = vpop.eup %721 }
 0x268   : > { %670 = vmatmul.mubr.f32.vlgmr.msra.gmra.mrb[0].mxu1 %v722_v63 }
 0x33b   : > { %v671_v0 = vpop.f32.mrb[0].mxu1 }
 0x33c   : > { %723 = vrcp.f32 %v671_v0  ;;  %v501_v1 = vpop.f32.mrb[1].mxu1 }
 0x33d   : > { %725 = vrcp.f32 %v501_v1 }
 0x346   : > { %v724_v2 = vpop.eup %723 }
 0x347   : > { %v726_v3 = vpop.eup %725  ;;  %516 = vrot.lane.b32.xlu1 %v724_v2, %s737_s25 }
 0x348   : > { %514 = vrot.lane.b32.xlu0 %v726_v3, %s737_s25 }
 0x3b9   : > { %v517_v4 = vpop.permute.xlu1 %516 }
 0x3ba   : > { %v515_v5 = vpop.permute.xlu0 %514  ;;  %v521_v7 = vmul.f32 %v671_v0, %v517_v4 }
 0x3bb   : > { %v520_v6 = vmul.f32 %v515_v5, %v501_v1 }
 0x3bc   : > { %524 = vst.msk [vmem:[%s253_s30 + $0x8] sm:$0xff] %vm522_vm4, %v521_v7 }
 0x3bd   : > { %523 = vst.msk [vmem:[%s253_s30] sm:$0xff] %vm522_vm4, %v520_v6 }
 0x3be PF: > { %s16_s21 = sadd.s32 1, %s733_s21  }
 0x3bf   : > { %p13_p4 = scmp.ge.s32.totalorder %s16_s21, 4  }
 0x3c1   :  { %15 = sbr.rel (!%p13_p4) target bundleno = 1 (0x1), region = 74 }

</bundles_post_ra>
